<compile_context>
chip_gen: v5e
topology: v5e:2x2
jax: 0.10.0
libtpu: 0.0.40
codegen_flags: <defaults>
</compile_context>

<pallas_src>
import math

import jax
import jax.numpy as jnp
from jax.experimental import pallas as pl
from jax.experimental.pallas import tpu as pltpu

BN_EPS = 1e-5
VMEM_LIMIT = 32 * 1024 * 1024


def _round_up(x, m):
    return (x + m - 1) // m * m


# ----------------------------------------------------------------------------
# Shared fused matmul kernel body
# ----------------------------------------------------------------------------
def _mm_kernel_factory(red_axis, relu, has_residual):
    """acc += x @ w over the reduction grid axis; epilogue: +bias [+residual] [ReLU]."""
    if has_residual:
        def kernel(x_ref, w_ref, b_ref, r_ref, o_ref, acc_ref):
            @pl.when(pl.program_id(red_axis) == 0)
            def _():
                acc_ref[...] = jnp.zeros_like(acc_ref)

            acc_ref[...] += jnp.dot(x_ref[...], w_ref[...],
                                    preferred_element_type=jnp.float32)

            @pl.when(pl.program_id(red_axis) == pl.num_programs(red_axis) - 1)
            def _():
                y = acc_ref[...] + b_ref[...] + r_ref[...].astype(jnp.float32)
                if relu:
                    y = jnp.maximum(y, 0.0)
                o_ref[...] = y.astype(o_ref.dtype)
        return kernel

    def kernel(x_ref, w_ref, b_ref, o_ref, acc_ref):
        @pl.when(pl.program_id(red_axis) == 0)
        def _():
            acc_ref[...] = jnp.zeros_like(acc_ref)

        acc_ref[...] += jnp.dot(x_ref[...], w_ref[...],
                                preferred_element_type=jnp.float32)

        @pl.when(pl.program_id(red_axis) == pl.num_programs(red_axis) - 1)
        def _():
            y = acc_ref[...] + b_ref[...]
            if relu:
                y = jnp.maximum(y, 0.0)
            o_ref[...] = y.astype(o_ref.dtype)
    return kernel


# ----------------------------------------------------------------------------
# Tile selection helpers (bf16 operands: second-to-last multiples of 16)
# ----------------------------------------------------------------------------
def _pick_m(M):
    if M <= 1024:
        tm = max(16, _round_up(M, 16))
        return tm, tm
    tm = 256
    return tm, _round_up(M, tm)


def _pick_n(N):
    if N % 256 == 0:
        return min(N, 256)
    if N % 128 == 0:
        return 128
    return N  # full-extent block: avoids HBM padding copies for ragged channel counts


def _pick_k(K, max_tk=1024):
    if K <= max_tk:
        tk = _round_up(K, 16)  # keep bf16 sublane packing aligned for the weight block
        return tk, tk
    nsteps = -(-K // max_tk)
    tk = _round_up(-(-K // nsteps), 128)
    return tk, tk * nsteps


# ----------------------------------------------------------------------------
# Fused (X @ W) + bias [+ residual] [ReLU] matmul (bf16 MXU, f32 accumulation)
# ----------------------------------------------------------------------------
def fused_matmul(x, w, bias, residual=None, relu=True, out_dtype=jnp.bfloat16):
    M, K = x.shape
    K2, N = w.shape
    assert K == K2

    tm, Mp = _pick_m(M)
    tn = _pick_n(N)
    tk, Kp = _pick_k(K)

    xb = x.astype(jnp.bfloat16)
    if (Mp, Kp) != (M, K):
        xb = jnp.pad(xb, ((0, Mp - M), (0, Kp - K)))
    wb = w.astype(jnp.bfloat16)
    if Kp != K:
        wb = jnp.pad(wb, ((0, Kp - K), (0, 0)))
    b2 = bias.astype(jnp.float32).reshape(1, N)

    in_specs = [
        pl.BlockSpec((tm, tk), lambda i, j, k: (i, k)),
        pl.BlockSpec((tk, tn), lambda i, j, k: (k, j)),
        pl.BlockSpec((1, tn), lambda i, j, k: (0, j)),
    ]
    args = [xb, wb, b2]
    if residual is not None:
        rb = residual.astype(jnp.bfloat16)
        if Mp != M:
            rb = jnp.pad(rb, ((0, Mp - M), (0, 0)))
        in_specs.append(pl.BlockSpec((tm, tn), lambda i, j, k: (i, j)))
        args.append(rb)

    kernel = _mm_kernel_factory(2, relu, residual is not None)
    out = pl.pallas_call(
        kernel,
        out_shape=jax.ShapeDtypeStruct((Mp, N), out_dtype),
        grid_spec=pltpu.PrefetchScalarGridSpec(
            num_scalar_prefetch=0,
            grid=(Mp // tm, N // tn, Kp // tk),
            in_specs=in_specs,
            out_specs=pl.BlockSpec((tm, tn), lambda i, j, k: (i, j)),
            scratch_shapes=[pltpu.VMEM((tm, tn), jnp.float32)],
        ),
        compiler_params=pltpu.CompilerParams(
            dimension_semantics=("parallel", "parallel", "arbitrary"),
            vmem_limit_bytes=VMEM_LIMIT),
    )(*args)
    if Mp != M:
        out = out[:M]
    return out


# ----------------------------------------------------------------------------
# Conv variants
# ----------------------------------------------------------------------------
def pointwise_conv_bn(x, w, stride, scale, bias, relu=True, residual=None):
    """1x1x1 Conv3d + folded BN (+residual) (+ReLU): direct matmul, no im2col."""
    B, T, H, W, Cin = x.shape
    Cout = w.shape[0]
    st, sh, sw = stride
    if (st, sh, sw) != (1, 1, 1):
        x = x[:, ::st, ::sh, ::sw, :]
    _, To, Ho, Wo, _ = x.shape
    X = x.reshape(B * To * Ho * Wo, Cin)
    Wm = (w[:, :, 0, 0, 0] * scale[:, None]).T            # (Cin, Cout), BN scale folded
    res2 = None
    if residual is not None:
        res2 = residual.reshape(B * To * Ho * Wo, Cout)
    Y = fused_matmul(X, Wm, bias, residual=res2, relu=relu)
    return Y.reshape(B, To, Ho, Wo, Cout)


def temporal_conv_bn_relu(x, w, stride_t, pad_t, scale, bias, relu=True):
    """(kt,1,1) Conv3d + folded BN + ReLU.

    The kt taps are accumulated inside one Pallas kernel via an extra grid axis whose
    index_map walks the zero-padded T axis (block size 1 along B*Tp) -- no im2col.
    """
    B, T, H, W, Cin = x.shape
    Cout, Cin2, kt, kh, kw = w.shape
    assert Cin == Cin2 and kh == 1 and kw == 1
    Tp = T + 2 * pad_t
    To = (Tp - kt) // stride_t + 1
    HW = H * W

    # Fold BN scale into the weight: (kt, Cin, Cout) bf16, tap-indexed.
    wt = jnp.transpose(w[:, :, :, 0, 0] * scale[:, None, None], (2, 1, 0))
    wt = wt.astype(jnp.bfloat16)
    b2 = bias.astype(jnp.float32).reshape(1, Cout)

    xp = jnp.pad(x.astype(jnp.bfloat16),
                 ((0, 0), (pad_t, pad_t), (0, 0), (0, 0), (0, 0)))
    x3 = xp.reshape(B * Tp, HW, Cin)

    tm, HWp = _pick_m(HW)
    Cin_p = _round_up(Cin, 16)
    if HWp != HW or Cin_p != Cin:
        x3 = jnp.pad(x3, ((0, 0), (0, HWp - HW), (0, Cin_p - Cin)))
    if Cin_p != Cin:
        wt = jnp.pad(wt, ((0, 0), (0, Cin_p - Cin), (0, 0)))
    tn = _pick_n(Cout)

    def x_map(o, i, j, u):
        return ((o // To) * Tp + (o % To) * stride_t + u, i, 0)

    kernel = _mm_kernel_factory(3, relu, False)
    out = pl.pallas_call(
        kernel,
        out_shape=jax.ShapeDtypeStruct((B * To, HWp, Cout), jnp.bfloat16),
        grid_spec=pltpu.PrefetchScalarGridSpec(
            num_scalar_prefetch=0,
            grid=(B * To, HWp // tm, Cout // tn, kt),
            in_specs=[
                pl.BlockSpec((None, tm, Cin_p), x_map),
                pl.BlockSpec((None, Cin_p, tn), lambda o, i, j, u: (u, 0, j)),
                pl.BlockSpec((1, tn), lambda o, i, j, u: (0, j)),
            ],
            out_specs=pl.BlockSpec((None, tm, tn), lambda o, i, j, u: (o, i, j)),
            scratch_shapes=[pltpu.VMEM((tm, tn), jnp.float32)],
        ),
        compiler_params=pltpu.CompilerParams(
            dimension_semantics=("parallel", "parallel", "parallel", "arbitrary"),
            vmem_limit_bytes=VMEM_LIMIT),
    )(x3, wt, b2)
    out = out[:, :HW, :]
    return out.reshape(B, To, H, W, Cout)


def im2col_conv_bn(x, w, stride, padding, scale, bias, relu=True, residual=None):
    """General Conv3d via bf16 im2col gather + fused matmul (used for spatial convs)."""
    B, T, H, W, Cin = x.shape
    Cout, Cin2, kt, kh, kw = w.shape
    assert Cin == Cin2
    st, sh, sw = stride
    pt, ph, pw = padding
    To = (T + 2 * pt - kt) // st + 1
    Ho = (H + 2 * ph - kh) // sh + 1
    Wo = (W + 2 * pw - kw) // sw + 1

    xp = jnp.pad(x.astype(jnp.bfloat16),
                 ((0, 0), (pt, pt), (ph, ph), (pw, pw), (0, 0)))
    cols = []
    for dt in range(kt):
        for dh in range(kh):
            for dw in range(kw):
                cols.append(xp[:, dt:dt + st * To:st,
                               dh:dh + sh * Ho:sh,
                               dw:dw + sw * Wo:sw, :])
    patches = jnp.stack(cols, axis=-1)                     # (B,To,Ho,Wo,Cin,kk)
    X = patches.reshape(B * To * Ho * Wo, Cin * kt * kh * kw)
    W2 = (w * scale[:, None, None, None, None]).reshape(Cout, -1).T

    res2 = None
    if residual is not None:
        res2 = residual.reshape(B * To * Ho * Wo, Cout)
    Y = fused_matmul(X, W2, bias, residual=res2, relu=relu)
    return Y.reshape(B, To, Ho, Wo, Cout)


def conv_bn_relu(x, w, stride, padding, scale, bias, relu=True, residual=None):
    kt, kh, kw = w.shape[2:]
    if (kt, kh, kw) == (1, 1, 1):
        assert padding == (0, 0, 0)
        return pointwise_conv_bn(x, w, stride, scale, bias, relu, residual)
    if (kh == 1 and kw == 1 and residual is None
            and stride[1] == 1 and stride[2] == 1
            and padding[1] == 0 and padding[2] == 0):
        return temporal_conv_bn_relu(x, w, stride[0], padding[0], scale, bias, relu)
    return im2col_conv_bn(x, w, stride, padding, scale, bias, relu, residual)


# ----------------------------------------------------------------------------
# Global average pool (tiled Pallas reduction, accumulates into the f32 output block)
# ----------------------------------------------------------------------------
def _pool_kernel_factory(inv):
    def kernel(x_ref, o_ref):
        @pl.when(pl.program_id(2) == 0)
        def _():
            o_ref[...] = jnp.zeros_like(o_ref)

        o_ref[...] += jnp.sum(x_ref[...].astype(jnp.float32), axis=0, keepdims=True)

        @pl.when(pl.program_id(2) == pl.num_programs(2) - 1)
        def _():
            o_ref[...] = o_ref[...] * inv
    return kernel


def avg_pool_all(x5):
    """AdaptiveAvgPool3d((1,1,1)): (B,T,H,W,C) -> (B,C)."""
    B, T, H, W, C = x5.shape
    R = T * H * W
    x3 = x5.reshape(B, R, C).astype(jnp.bfloat16)
    tr, Rp = _pick_m(R)
    if Rp != R:
        x3 = jnp.pad(x3, ((0, 0), (0, Rp - R), (0, 0)))
    tc = _pick_n(C)
    out = pl.pallas_call(
        _pool_kernel_factory(1.0 / R),
        out_shape=jax.ShapeDtypeStruct((B, 1, C), jnp.float32),
        grid_spec=pltpu.PrefetchScalarGridSpec(
            num_scalar_prefetch=0,
            grid=(B, C // tc, Rp // tr),
            in_specs=[pl.BlockSpec((None, tr, tc), lambda b, j, r: (b, r, j))],
            out_specs=pl.BlockSpec((None, 1, tc), lambda b, j, r: (b, 0, j)),
        ),
        compiler_params=pltpu.CompilerParams(
            dimension_semantics=("parallel", "parallel", "arbitrary"),
            vmem_limit_bytes=VMEM_LIMIT),
    )(x3)
    return out.reshape(B, C)


# ----------------------------------------------------------------------------
# Parameter construction (deterministic, mirrors VideoResNet.__init__)
# ----------------------------------------------------------------------------
def _kaiming(key, shape):
    # kaiming_normal_(mode='fan_out', nonlinearity='relu') for Conv3d
    fan_out = shape[0] * shape[2] * shape[3] * shape[4]
    std = math.sqrt(2.0 / fan_out)
    return std * jax.random.normal(key, shape, dtype=jnp.float32)


def _bn_fold(c):
    # BN at init: gamma=1, beta=0, running_mean=0, running_var=1 (eval-mode fold)
    scale = jnp.full((c,), 1.0 / math.sqrt(1.0 + BN_EPS), jnp.float32)
    bias = jnp.zeros((c,), jnp.float32)
    return scale, bias


def _midplanes(inplanes, planes):
    return inplanes * planes * 3 * 3 * 3 // (inplanes * 3 * 3 + 3 * planes)


def build_params(key, layers=(1, 1, 1, 2), num_classes=32):
    keys = iter(jax.random.split(key, 64))
    expansion = 4
    params = {
        "stem": {
            "w1": _kaiming(next(keys), (45, 3, 1, 7, 7)),    # (1,7,7) s(1,2,2) p(0,3,3)
            "bn1": _bn_fold(45),
            "w2": _kaiming(next(keys), (64, 45, 3, 1, 1)),   # (3,1,1) s1 p(1,0,0)
            "bn2": _bn_fold(64),
        }
    }
    inplanes = 64
    layer_params = []
    for planes, nblocks, stride in zip((64, 128, 256, 512), layers, (1, 2, 2, 2)):
        blocks = []
        for bi in range(nblocks):
            s = stride if bi == 0 else 1
            mid = _midplanes(inplanes, planes)
            blk = {
                "w1": _kaiming(next(keys), (planes, inplanes, 1, 1, 1)),
                "bn1": _bn_fold(planes),
                "w2a": _kaiming(next(keys), (mid, planes, 1, 3, 3)),   # spatial
                "bn2a": _bn_fold(mid),
                "w2b": _kaiming(next(keys), (planes, mid, 3, 1, 1)),   # temporal
                "bn2b": _bn_fold(planes),
                "w3": _kaiming(next(keys), (planes * expansion, planes, 1, 1, 1)),
                "bn3": _bn_fold(planes * expansion),
                "stride": s,
                "downsample": None,
            }
            if bi == 0 and (s != 1 or inplanes != planes * expansion):
                blk["downsample"] = {
                    "w": _kaiming(next(keys), (planes * expansion, inplanes, 1, 1, 1)),
                    "bn": _bn_fold(planes * expansion),
                }
            blocks.append(blk)
            inplanes = planes * expansion
        layer_params.append(blocks)
    params["layers"] = layer_params
    params["fc_w"] = 0.01 * jax.random.normal(next(keys),
                                              (num_classes, 512 * expansion),
                                              dtype=jnp.float32)
    params["fc_b"] = jnp.zeros((num_classes,), jnp.float32)
    return params


# ----------------------------------------------------------------------------
# Forward pass
# ----------------------------------------------------------------------------
def bottleneck_forward(x, blk):
    s = blk["stride"]
    if blk["downsample"] is not None:
        ds = blk["downsample"]
        residual = conv_bn_relu(x, ds["w"], (s, s, s), (0, 0, 0),
                                ds["bn"][0], ds["bn"][1], relu=False)
    else:
        residual = x
    out = conv_bn_relu(x, blk["w1"], (1, 1, 1), (0, 0, 0),
                       blk["bn1"][0], blk["bn1"][1], relu=True)
    # Conv2Plus1D: spatial (1,3,3) stride (1,s,s), then temporal (3,1,1) stride (s,1,1)
    out = conv_bn_relu(out, blk["w2a"], (1, s, s), (0, 1, 1),
                       blk["bn2a"][0], blk["bn2a"][1], relu=True)
    out = conv_bn_relu(out, blk["w2b"], (s, 1, 1), (1, 0, 0),
                       blk["bn2b"][0], blk["bn2b"][1], relu=True)
    # conv3 + bn3, then += residual, then ReLU (all fused into one kernel call)
    out = conv_bn_relu(out, blk["w3"], (1, 1, 1), (0, 0, 0),
                       blk["bn3"][0], blk["bn3"][1], relu=True, residual=residual)
    return out


def video_resnet_forward(params, x_ncdhw):
    x = jnp.transpose(x_ncdhw, (0, 2, 3, 4, 1)).astype(jnp.bfloat16)  # NCDHW -> NDHWC
    st = params["stem"]
    x = conv_bn_relu(x, st["w1"], (1, 2, 2), (0, 3, 3), st["bn1"][0], st["bn1"][1])
    x = conv_bn_relu(x, st["w2"], (1, 1, 1), (1, 0, 0), st["bn2"][0], st["bn2"][1])

    for blk in params["layers"][0]:
        x = bottleneck_forward(x, blk)
    for blk in params["layers"][1]:
        x = bottleneck_forward(x, blk)
    for blk in params["layers"][2]:
        x = bottleneck_forward(x, blk)

    layer4 = params["layers"][3]
    x = bottleneck_forward(x, layer4[0])
    feats = [x]
    for blk in layer4[1:]:
        x = bottleneck_forward(x, blk)
        feats.append(x)
    # x_feat in PyTorch layout: (num_blocks_in_layer4, B, C, T, H, W), float32
    x_feat = jnp.stack(
        [jnp.transpose(f.astype(jnp.float32), (0, 4, 1, 2, 3)) for f in feats], axis=0)

    pooled = avg_pool_all(x)                                          # (B, 2048) f32
    logits = fused_matmul(pooled, params["fc_w"].T, params["fc_b"],
                          relu=False, out_dtype=jnp.float32)
    return logits, x_feat


if __name__ == "__main__":
    key = jax.random.PRNGKey(0)
    pkey, xkey = jax.random.split(key)
    num_classes = 32
    params = build_params(pkey, layers=(1, 1, 1, 2), num_classes=num_classes)
    # PyTorch-style input: (B, C, T, H, W)
    x = jax.random.normal(xkey, (1, 3, 4, 16, 16), dtype=jnp.float32)
    logits, x_feat = video_resnet_forward(params, x)
    jax.block_until_ready((logits, x_feat))
    assert logits.shape == (1, num_classes)
    assert x_feat.shape == (2, 1, 2048, 1, 1, 1)
    assert bool(jnp.all(jnp.isfinite(logits)))
    print("KERNEL_OK")
</pallas_src>

<mosaic_0001>
module attributes {stable_mosaic.version = 11 : i64} {
  func.func @kernel(%arg0: i32, %arg1: i32, %arg2: i32, %arg3: memref<256x160xbf16, #tpu.memory_space<vmem>>, %arg4: memref<160x45xbf16, #tpu.memory_space<vmem>>, %arg5: memref<1x45xf32, #tpu.memory_space<vmem>>, %arg6: memref<256x45xbf16, #tpu.memory_space<vmem>>, %arg7: memref<256x45xf32, #tpu.memory_space<vmem>>) attributes {dimension_semantics = [#tpu.dimension_semantics<parallel>, #tpu.dimension_semantics<parallel>, #tpu.dimension_semantics<arbitrary>], iteration_bounds = array<i64: 1, 1, 1>, scalar_prefetch = 0 : i64, scratch_operands = 1 : i64, tpu.core_type = #tpu.core_type<tc>, window_params = [{transform_indices = @transform_0, window_bounds = array<i64: 256, 160>}, {transform_indices = @transform_1, window_bounds = array<i64: 160, 45>}, {transform_indices = @transform_2, window_bounds = array<i64: 1, 45>}, {transform_indices = @transform_3, window_bounds = array<i64: 256, 45>}]} {
    %c0_i32 = arith.constant 0 : i32
    %0 = arith.cmpi eq, %arg2, %c0_i32 : i32
    %1 = arith.extui %0 : i1 to i32
    %c0_i32_0 = arith.constant 0 : i32
    %2 = arith.cmpi ne, %1, %c0_i32_0 : i32
    scf.if %2 {
      %cst_10 = arith.constant 0.000000e+00 : f32
      %12 = vector.broadcast %cst_10 : f32 to vector<256x45xf32>
      %c0_11 = arith.constant 0 : index
      %c0_12 = arith.constant 0 : index
      %13 = vector.load %arg7[%c0_11, %c0_12] : memref<256x45xf32, #tpu.memory_space<vmem>>, vector<256x45xf32>
      tpu.vector_store %arg7[%c0_11, %c0_12], %12 {strides = array<i32>} : memref<256x45xf32, #tpu.memory_space<vmem>>, vector<256x45xf32>,
    } else {
    }
    %c0 = arith.constant 0 : index
    %c0_1 = arith.constant 0 : index
    %3 = vector.load %arg7[%c0, %c0_1] : memref<256x45xf32, #tpu.memory_space<vmem>>, vector<256x45xf32>
    %c0_2 = arith.constant 0 : index
    %c0_3 = arith.constant 0 : index
    %4 = vector.load %arg3[%c0_2, %c0_3] : memref<256x160xbf16, #tpu.memory_space<vmem>>, vector<256x160xbf16>
    %c0_4 = arith.constant 0 : index
    %c0_5 = arith.constant 0 : index
    %5 = vector.load %arg4[%c0_4, %c0_5] : memref<160x45xbf16, #tpu.memory_space<vmem>>, vector<160x45xbf16>
    %cst = arith.constant dense<0.000000e+00> : vector<256x45xf32>
    %6 = tpu.matmul %4, %5, %cst {dimension_numbers = #tpu.dot_dimension_numbers<[1], [0], [0], [1], [0, 0, 1, 1], [], []>} : vector<256x160xbf16>, vector<160x45xbf16>, vector<256x45xf32> -> vector<256x45xf32>
    %7 = arith.addf %3, %6 : vector<256x45xf32>
    %c0_6 = arith.constant 0 : index
    %c0_7 = arith.constant 0 : index
    %8 = vector.load %arg7[%c0_6, %c0_7] : memref<256x45xf32, #tpu.memory_space<vmem>>, vector<256x45xf32>
    tpu.vector_store %arg7[%c0_6, %c0_7], %7 {strides = array<i32>} : memref<256x45xf32, #tpu.memory_space<vmem>>, vector<256x45xf32>,
    %c0_i32_8 = arith.constant 0 : i32
    %9 = arith.cmpi eq, %arg2, %c0_i32_8 : i32
    %10 = arith.extui %9 : i1 to i32
    %c0_i32_9 = arith.constant 0 : i32
    %11 = arith.cmpi ne, %10, %c0_i32_9 : i32
    scf.if %11 {
      %c0_10 = arith.constant 0 : index
      %c0_11 = arith.constant 0 : index
      %12 = vector.load %arg7[%c0_10, %c0_11] : memref<256x45xf32, #tpu.memory_space<vmem>>, vector<256x45xf32>
      %c0_12 = arith.constant 0 : index
      %c0_13 = arith.constant 0 : index
      %13 = vector.load %arg5[%c0_12, %c0_13] : memref<1x45xf32, #tpu.memory_space<vmem>>, vector<1x45xf32>
      %14 = vector.broadcast %13 : vector<1x45xf32> to vector<256x45xf32>
      %15 = arith.addf %12, %14 : vector<256x45xf32>
      %cst_14 = arith.constant 0.000000e+00 : f32
      %16 = vector.broadcast %cst_14 : f32 to vector<256x45xf32>
      %17 = arith.maximumf %15, %16 : vector<256x45xf32>
      %18 = arith.truncf %17 : vector<256x45xf32> to vector<256x45xbf16>
      %c0_15 = arith.constant 0 : index
      %c0_16 = arith.constant 0 : index
      %19 = vector.load %arg6[%c0_15, %c0_16] : memref<256x45xbf16, #tpu.memory_space<vmem>>, vector<256x45xbf16>
      tpu.vector_store %arg6[%c0_15, %c0_16], %18 {strides = array<i32>} : memref<256x45xbf16, #tpu.memory_space<vmem>>, vector<256x45xbf16>,
    } else {
    }
    return
  }
  func.func @transform_0(%arg0: i32, %arg1: i32, %arg2: i32) -> (i32, i32) {
    %c0_i32 = arith.constant 0 : i32
    return %arg0, %arg2 : i32, i32
  }
  func.func @transform_1(%arg0: i32, %arg1: i32, %arg2: i32) -> (i32, i32) {
    %c0_i32 = arith.constant 0 : i32
    return %arg2, %arg1 : i32, i32
  }
  func.func @transform_2(%arg0: i32, %arg1: i32, %arg2: i32) -> (i32, i32) {
    %c0_i32 = arith.constant 0 : i32
    %c0_i32_0 = arith.constant 0 : i32
    return %c0_i32, %arg1 : i32, i32
  }
  func.func @transform_3(%arg0: i32, %arg1: i32, %arg2: i32) -> (i32, i32) {
    %c0_i32 = arith.constant 0 : i32
    return %arg0, %arg1 : i32, i32
  }
}

</mosaic_0001>

<bundles_post_ra>
// kernel: tpu_custom_call.1
= control target key start
LH: loop header
LB: loop body
LE: loop exit
PB: predicated region body
PF: predicated region fallthrough
CT: control target
= control target key end

     0   :  { %vm340_vm0 = vcmask 261120   ;;  %vm19_vm1 = vcmask 367616   ;;  %vm767_vm2 = vcmask 363520   ;;  %s1563_s1 = inlined_call_operand.vmem [shape: bf16[160,45], index: 1, kind: input, shape index: {}]   ;;  %s1564_s0 = inlined_call_operand.vmem [shape: bf16[256,160], index: 0, kind: input, shape index: {}]   ;;  %s1565_s2 = inlined_call_operand.vmem [shape: f32[1,45], index: 2, kind: input, shape index: {}]   ;;  %s1566_s3 = inlined_call_operand.vmem [shape: bf16[256,45], index: 3, kind: output, shape index: {}]  }
   0x1   :  { %v1027_v0 = vld [vmem:[%s1563_s1 + $0x38] sm:$0xff]  ;;  %v1029_v1 = vld [vmem:[%s1563_s1 + $0x48] sm:$0xff]  ;;  %v1026_v2 = vld [vmem:[%s1563_s1 + $0x30] sm:$0xff] }
   0x2   :  { %389 = vmatpush.bf16.msra.mxu0 %v1027_v0  ;;  %1030 = vmatpush.bf16.msra.mxu2 %v1027_v0  ;;  %v1028_v3 = vld [vmem:[%s1563_s1 + $0x40] sm:$0xff]  ;;  %v808_v5 = vld [vmem:[%s1564_s0 + $0x8] sm:$0xf0]  ;;  %v1006_v8 = vld [vmem:[%s1564_s0 + $0x94] sm:$0xf] }
   0x3   :  { %484 = vmatpush.bf16.msra.mxu1 %v1029_v1  ;;  %v988_v4 = vld [vmem:[%s1564_s0 + $0x4] sm:$0xf]  ;;  %1038 = vmatpush.bf16.msra.mxu3 %v1029_v1  ;;  %v1025_v7 = vld [vmem:[%s1563_s1 + $0x28] sm:$0xff]  ;;  %v880_v9 = vld [vmem:[%s1564_s0 + $0x98] sm:$0xf0] }
   0x4   :  { %v811_v6 = vor.u32 %v988_v4, %v808_v5  ;;  %v883_v10 = vor.u32 %v1006_v8, %v880_v9  ;;  %v1024_v11 = vld [vmem:[%s1563_s1 + $0x20] sm:$0xff]  ;;  %v1023_v12 = vld [vmem:[%s1563_s1 + $0x18] sm:$0xff]  ;;  %v1022_v13 = vld [vmem:[%s1563_s1 + $0x10] sm:$0xff] }
   0x5   :  { %v990_v14 = vld [vmem:[%s1564_s0 + $0x14] sm:$0xf]  ;;  %v816_v15 = vld [vmem:[%s1564_s0 + $0x18] sm:$0xf0]  ;;  %v1021_v17 = vld [vmem:[%s1563_s1 + $0x8] sm:$0xff] }
   0x6   :  { %390 = vmatpush.bf16.msra.mxu0 %v1026_v2  ;;  %1031 = vmatpush.bf16.msra.mxu2 %v1026_v2  ;;  %v819_v16 = vor.u32 %v990_v14, %v816_v15  ;;  %v1008_v18 = vld [vmem:[%s1564_s0 + $0xa4] sm:$0xf]  ;;  %v888_v19 = vld [vmem:[%s1564_s0 + $0xa8] sm:$0xf0]  ;;  %v806_v22 = vld [vmem:[%s1564_s0] sm:$0xf] }
   0x7   :  { %485 = vmatpush.bf16.msra.mxu1 %v1028_v3  ;;  %1039 = vmatpush.bf16.msra.mxu3 %v1028_v3  ;;  %v891_v20 = vor.u32 %v1008_v18, %v888_v19  ;;  %v1020_v21 = vld [vmem:[%s1563_s1] sm:$0xff]  ;;  %v989_v23 = vld [vmem:[%s1564_s0 + $0x4] sm:$0xf0]  ;;  %v824_v29 = vld [vmem:[%s1564_s0 + $0x28] sm:$0xf0] }
   0x8   :  { %v870_v24 = vld [vmem:[%s1564_s0 + $0x80] sm:$0xf]  ;;  %v1005_v25 = vld [vmem:[%s1564_s0 + $0x84] sm:$0xf0]  ;;  %v807_v26 = vor.u32 %v989_v23, %v806_v22  ;;  %v992_v28 = vld [vmem:[%s1564_s0 + $0x24] sm:$0xf] }
   0x9   :  { %v871_v27 = vor.u32 %v1005_v25, %v870_v24  ;;  %v827_v30 = vor.u32 %v992_v28, %v824_v29  ;;  %v1010_v31 = vld [vmem:[%s1564_s0 + $0xb4] sm:$0xf]  ;;  %v896_v32 = vld [vmem:[%s1564_s0 + $0xb8] sm:$0xf0]  ;;  %v814_v34 = vld [vmem:[%s1564_s0 + $0x10] sm:$0xf] }
   0xa   :  { %972 = vmatmul.msk.bf16.vlgmr.msra.gmra.mxu1 %vm340_vm0, %v811_v6  ;;  %391 = vmatpush.bf16.msra.mxu0 %v1025_v7  ;;  %v899_v33 = vor.u32 %v1010_v31, %v896_v32  ;;  %v991_v35 = vld [vmem:[%s1564_s0 + $0x14] sm:$0xf0]  ;;  %v878_v36 = vld [vmem:[%s1564_s0 + $0x90] sm:$0xf]  ;;  %v994_v40 = vld [vmem:[%s1564_s0 + $0x34] sm:$0xf] }
   0xb   :  { %1032 = vmatpush.bf16.msra.mxu2 %v1025_v7  ;;  %981 = vmatmul.msk.bf16.vlgmr.msra.gmra.mxu3 %vm340_vm0, %v883_v10  ;;  %v1007_v37 = vld [vmem:[%s1564_s0 + $0x94] sm:$0xf0]  ;;  %v815_v38 = vor.u32 %v991_v35, %v814_v34  ;;  %v832_v41 = vld [vmem:[%s1564_s0 + $0x38] sm:$0xf0]  ;;  %v1012_v43 = vld [vmem:[%s1564_s0 + $0xc4] sm:$0xf] }
   0xc   :  { %v879_v39 = vor.u32 %v1007_v37, %v878_v36  ;;  %v835_v42 = vor.u32 %v994_v40, %v832_v41  ;;  %v904_v44 = vld [vmem:[%s1564_s0 + $0xc8] sm:$0xf0]  ;;  %v822_v46 = vld [vmem:[%s1564_s0 + $0x20] sm:$0xf]  ;;  %v993_v47 = vld [vmem:[%s1564_s0 + $0x24] sm:$0xf0] }
   0xd   :  { %v907_v45 = vor.u32 %v1012_v43, %v904_v44  ;;  %v886_v48 = vld [vmem:[%s1564_s0 + $0xa0] sm:$0xf]  ;;  %v1009_v49 = vld [vmem:[%s1564_s0 + $0xa4] sm:$0xf0]  ;;  %v823_v50 = vor.u32 %v993_v47, %v822_v46  ;;  %v996_v52 = vld [vmem:[%s1564_s0 + $0x44] sm:$0xf] }
   0xe   :  { %392 = vmatpush.bf16.msra.mxu0 %v1024_v11  ;;  %v887_v51 = vor.u32 %v1009_v49, %v886_v48  ;;  %v840_v53 = vld [vmem:[%s1564_s0 + $0x48] sm:$0xf0]  ;;  %v1014_v55 = vld [vmem:[%s1564_s0 + $0xd4] sm:$0xf]  ;;  %v912_v56 = vld [vmem:[%s1564_s0 + $0xd8] sm:$0xf0] }
   0xf   :  { %1033 = vmatpush.bf16.msra.mxu2 %v1024_v11  ;;  %v843_v54 = vor.u32 %v996_v52, %v840_v53  ;;  %v915_v57 = vor.u32 %v1014_v55, %v912_v56  ;;  %v830_v58 = vld [vmem:[%s1564_s0 + $0x30] sm:$0xf]  ;;  %v995_v59 = vld [vmem:[%s1564_s0 + $0x34] sm:$0xf0]  ;;  %v998_v0 = vld [vmem:[%s1564_s0 + $0x54] sm:$0xf] }
  0x10   :  { %v894_v60 = vld [vmem:[%s1564_s0 + $0xb0] sm:$0xf]  ;;  %v1011_v61 = vld [vmem:[%s1564_s0 + $0xb4] sm:$0xf0]  ;;  %v831_v62 = vor.u32 %v995_v59, %v830_v58  ;;  %v848_v1 = vld [vmem:[%s1564_s0 + $0x58] sm:$0xf0] }
  0x11   :  { %v895_v63 = vor.u32 %v1011_v61, %v894_v60  ;;  %v851_v2 = vor.u32 %v998_v0, %v848_v1  ;;  %v1016_v3 = vld [vmem:[%s1564_s0 + $0xe4] sm:$0xf]  ;;  %v920_v4 = vld [vmem:[%s1564_s0 + $0xe8] sm:$0xf0]  ;;  %v838_v6 = vld [vmem:[%s1564_s0 + $0x40] sm:$0xf] }
  0x12   :  { %393 = vmatpush.bf16.msra.mxu0 %v1023_v12  ;;  %v923_v5 = vor.u32 %v1016_v3, %v920_v4  ;;  %v997_v7 = vld [vmem:[%s1564_s0 + $0x44] sm:$0xf0]  ;;  %v902_v8 = vld [vmem:[%s1564_s0 + $0xc0] sm:$0xf]  ;;  %v1018_v15 = vld [vmem:[%s1564_s0 + $0xf4] sm:$0xf] }
  0x13   :  { %1034 = vmatpush.bf16.msra.mxu2 %v1023_v12  ;;  %v1013_v9 = vld [vmem:[%s1564_s0 + $0xc4] sm:$0xf0]  ;;  %v839_v10 = vor.u32 %v997_v7, %v838_v6  ;;  %v1000_v12 = vld [vmem:[%s1564_s0 + $0x64] sm:$0xf]  ;;  %v846_v18 = vld [vmem:[%s1564_s0 + $0x50] sm:$0xf] }
  0x14   :  { %v903_v11 = vor.u32 %v1013_v9, %v902_v8  ;;  %v999_v19 = vld [vmem:[%s1564_s0 + $0x54] sm:$0xf0]  ;;  %v1002_v24 = vld [vmem:[%s1564_s0 + $0x74] sm:$0xf]  ;;  %v864_v25 = vld [vmem:[%s1564_s0 + $0x78] sm:$0xf0] }
  0x15   :  { %v847_v22 = vor.u32 %v999_v19, %v846_v18  ;;  %v854_v28 = vld [vmem:[%s1564_s0 + $0x60] sm:$0xf]  ;;  %v1001_v29 = vld [vmem:[%s1564_s0 + $0x64] sm:$0xf0]  ;;  %v1004_v34 = vld [vmem:[%s1564_s0 + $0x84] sm:$0xf] }
  0x16   :  { %394 = vmatpush.bf16.msra.mxu0 %v1022_v13  ;;  %v1017_v31 = vld [vmem:[%s1564_s0 + $0xe4] sm:$0xf0]  ;;  %v855_v32 = vor.u32 %v1001_v29, %v854_v28  ;;  %v872_v35 = vld [vmem:[%s1564_s0 + $0x88] sm:$0xf0]  ;;  %v926_v40 = vld [vmem:[%s1564_s0 + $0xf0] sm:$0xf] }
  0x17   :  { %1035 = vmatpush.bf16.msra.mxu2 %v1022_v13  ;;  %v856_v13 = vld [vmem:[%s1564_s0 + $0x68] sm:$0xf0]  ;;  %v875_v36 = vor.u32 %v1004_v34, %v872_v35  ;;  %v1019_v41 = vld [vmem:[%s1564_s0 + $0xf4] sm:$0xf0]  ;;  %v1339_v56 = vld [vmem:[%s1565_s2] ss:$0 sm:$0xff] }
  0x18   :  { %v859_v14 = vor.u32 %v1000_v12, %v856_v13  ;;  %v927_v43 = vor.u32 %v1019_v41, %v926_v40 }
  0x1a   :  { %973 = vmatmul.msk.bf16.gmra.mxu1 %vm340_vm0, %v819_v16  ;;  %395 = vmatpush.bf16.msra.mxu0 %v1021_v17  ;;  %v928_v16 = vld [vmem:[%s1564_s0 + $0xf8] sm:$0xf0] }
  0x1b   :  { %1036 = vmatpush.bf16.msra.mxu2 %v1021_v17  ;;  %982 = vmatmul.msk.bf16.gmra.mxu3 %vm340_vm0, %v891_v20  ;;  %v931_v17 = vor.u32 %v1018_v15, %v928_v16  ;;  %v910_v20 = vld [vmem:[%s1564_s0 + $0xd0] sm:$0xf] }
  0x1e   :  { %396 = vmatpush.bf16.msra.mxu0 %v1020_v21 }
  0x1f   :  { %1037 = vmatpush.bf16.msra.mxu2 %v1020_v21  ;;  %v1015_v21 = vld [vmem:[%s1564_s0 + $0xd4] sm:$0xf0] }
  0x20   :  { %v911_v23 = vor.u32 %v1015_v21, %v910_v20 }
  0x21   :  { %397 = vmatmul.bf16.vlgmr.msra.gmra.mxu0 %v807_v26  ;;  %v867_v26 = vor.u32 %v1002_v24, %v864_v25 }
  0x22   :  { %437 = vmatmul.bf16.vlgmr.msra.gmra.mxu2 %v871_v27  ;;  %v1042_v27 = vmov 0.0  }
  0x23   :  { %20 = vst.msk [vmem:[#allocation2] sm:$0xff] %vm19_vm1, %v1042_v27 }
  0x24   :  { %21 = vst.msk [vmem:[#allocation2 + $0x8] sm:$0xff] %vm19_vm1, %v1042_v27 }
  0x25   :  { %22 = vst.msk [vmem:[#allocation2 + $0x10] sm:$0xff] %vm19_vm1, %v1042_v27 }
  0x26   :  { %23 = vst.msk [vmem:[#allocation2 + $0x18] sm:$0xff] %vm19_vm1, %v1042_v27 }
  0x27   :  { %24 = vst.msk [vmem:[#allocation2 + $0x20] sm:$0xff] %vm19_vm1, %v1042_v27 }
  0x28   :  { %25 = vst.msk [vmem:[#allocation2 + $0x28] sm:$0xff] %vm19_vm1, %v1042_v27 }
  0x29   :  { %26 = vst.msk [vmem:[#allocation2 + $0x30] sm:$0xff] %vm19_vm1, %v1042_v27 }
  0x2a   :  { %974 = vmatmul.msk.bf16.gmra.mxu1 %vm340_vm0, %v827_v30  ;;  %v918_v30 = vld [vmem:[%s1564_s0 + $0xe0] sm:$0xf]  ;;  %27 = vst.msk [vmem:[#allocation2 + $0x38] sm:$0xff] %vm19_vm1, %v1042_v27 }
  0x2b   :  { %983 = vmatmul.msk.bf16.gmra.mxu3 %vm340_vm0, %v899_v33  ;;  %v919_v33 = vor.u32 %v1017_v31, %v918_v30  ;;  %28 = vst.msk [vmem:[#allocation2 + $0x40] sm:$0xff] %vm19_vm1, %v1042_v27  ;;  %v52_v47 = vld [vmem:[#allocation2] sm:$0xff] }
  0x2c   :  { %29 = vst.msk [vmem:[#allocation2 + $0x48] sm:$0xff] %vm19_vm1, %v1042_v27  ;;  %v54_v0 = vld [vmem:[#allocation2 + $0x10] sm:$0xff] }
  0x2d   :  { %30 = vst.msk [vmem:[#allocation2 + $0x50] sm:$0xff] %vm19_vm1, %v1042_v27  ;;  %v55_v13 = vld [vmem:[#allocation2 + $0x18] sm:$0xff] }
  0x2e   :  { %31 = vst.msk [vmem:[#allocation2 + $0x58] sm:$0xff] %vm19_vm1, %v1042_v27 }
  0x2f   :  { %32 = vst.msk [vmem:[#allocation2 + $0x60] sm:$0xff] %vm19_vm1, %v1042_v27 }
  0x30   :  { %33 = vst.msk [vmem:[#allocation2 + $0x68] sm:$0xff] %vm19_vm1, %v1042_v27 }
  0x31   :  { %402 = vmatmul.bf16.gmra.mxu0 %v815_v38  ;;  %34 = vst.msk [vmem:[#allocation2 + $0x70] sm:$0xff] %vm19_vm1, %v1042_v27  ;;  %v862_v38 = vld [vmem:[%s1564_s0 + $0x70] sm:$0xf] }
  0x32   :  { %442 = vmatmul.bf16.gmra.mxu2 %v879_v39  ;;  %35 = vst.msk [vmem:[#allocation2 + $0x78] sm:$0xff] %vm19_vm1, %v1042_v27  ;;  %v1003_v39 = vld [vmem:[%s1564_s0 + $0x74] sm:$0xf0] }
  0x33   :  { %36 = vst.msk [vmem:[#allocation2 + $0x80] sm:$0xff] %vm19_vm1, %v1042_v27 }
  0x34   :  { %37 = vst.msk [vmem:[#allocation2 + $0x88] sm:$0xff] %vm19_vm1, %v1042_v27 }
  0x35   :  { %38 = vst.msk [vmem:[#allocation2 + $0x90] sm:$0xff] %vm19_vm1, %v1042_v27 }
  0x36   :  { %39 = vst.msk [vmem:[#allocation2 + $0x98] sm:$0xff] %vm19_vm1, %v1042_v27 }
  0x37   :  { %40 = vst.msk [vmem:[#allocation2 + $0xa0] sm:$0xff] %vm19_vm1, %v1042_v27 }
  0x38   :  { %41 = vst.msk [vmem:[#allocation2 + $0xa8] sm:$0xff] %vm19_vm1, %v1042_v27 }
  0x39   :  { %42 = vst.msk [vmem:[#allocation2 + $0xb0] sm:$0xff] %vm19_vm1, %v1042_v27 }
  0x3a   :  { %975 = vmatmul.msk.bf16.gmra.mxu1 %vm340_vm0, %v835_v42  ;;  %v863_v42 = vor.u32 %v1003_v39, %v862_v38  ;;  %43 = vst.msk [vmem:[#allocation2 + $0xb8] sm:$0xff] %vm19_vm1, %v1042_v27 }
  0x3b   :  { %984 = vmatmul.msk.bf16.gmra.mxu3 %vm340_vm0, %v907_v45  ;;  %44 = vst.msk [vmem:[#allocation2 + $0xc0] sm:$0xff] %vm19_vm1, %v1042_v27 }
  0x3c   :  { %45 = vst.msk [vmem:[#allocation2 + $0xc8] sm:$0xff] %vm19_vm1, %v1042_v27 }
  0x3d   :  { %46 = vst.msk [vmem:[#allocation2 + $0xd0] sm:$0xff] %vm19_vm1, %v1042_v27  ;;  %v71_v24 = vld [vmem:[#allocation2 + $0x98] sm:$0xff] }
  0x3e   :  { %47 = vst.msk [vmem:[#allocation2 + $0xd8] sm:$0xff] %vm19_vm1, %v1042_v27  ;;  %v72_v41 = vld [vmem:[#allocation2 + $0xa0] sm:$0xff] }
  0x3f   :  { %48 = vst.msk [vmem:[#allocation2 + $0xe0] sm:$0xff] %vm19_vm1, %v1042_v27 }
  0x40   :  { %49 = vst.msk [vmem:[#allocation2 + $0xe8] sm:$0xff] %vm19_vm1, %v1042_v27 }
  0x41   :  { %407 = vmatmul.bf16.gmra.mxu0 %v823_v50  ;;  %50 = vst.msk [vmem:[#allocation2 + $0xf0] sm:$0xff] %vm19_vm1, %v1042_v27 }
  0x42   :  { %447 = vmatmul.bf16.gmra.mxu2 %v887_v51  ;;  %51 = vst.msk [vmem:[#allocation2 + $0xf8] sm:$0xff] %vm19_vm1, %v1042_v27  ;;  %v56_v27 = vld [vmem:[#allocation2 + $0x20] sm:$0xff] }
  0x4a   :  { %976 = vmatmul.msk.bf16.gmra.mxu1 %vm340_vm0, %v843_v54  ;;  %v53_v54 = vld [vmem:[#allocation2 + $0x8] sm:$0xff] }
  0x4b   :  { %985 = vmatmul.msk.bf16.gmra.mxu3 %vm340_vm0, %v915_v57 }
  0x51   :  { %412 = vmatmul.bf16.gmra.mxu0 %v831_v62 }
  0x52   :  { %452 = vmatmul.bf16.gmra.mxu2 %v895_v63 }
  0x5a   :  { %977 = vmatmul.msk.bf16.gmra.mxu1 %vm340_vm0, %v851_v2 }
  0x5b   :  { %986 = vmatmul.msk.bf16.gmra.mxu3 %vm340_vm0, %v923_v5 }
  0x61   :  { %417 = vmatmul.bf16.gmra.mxu0 %v839_v10  ;;  %v70_v10 = vld [vmem:[#allocation2 + $0x90] sm:$0xff] }
  0x62   :  { %457 = vmatmul.bf16.gmra.mxu2 %v903_v11 }
  0x6a   :  { %978 = vmatmul.msk.bf16.gmra.mxu1 %vm340_vm0, %v859_v14 }
  0x6b   :  { %987 = vmatmul.msk.bf16.gmra.mxu3 %vm340_vm0, %v931_v17 }
  0x71   :  { %422 = vmatmul.bf16.gmra.mxu0 %v847_v22 }
  0x72   :  { %462 = vmatmul.bf16.gmra.mxu2 %v911_v23 }
  0x7a   :  { %979 = vmatmul.msk.bf16.gmra.mxu1 %vm340_vm0, %v867_v26 }
  0x81   :  { %427 = vmatmul.bf16.gmra.mxu0 %v855_v32 }
  0x82   :  { %467 = vmatmul.bf16.gmra.mxu2 %v919_v33 }
  0x87   :  { %v487_v37 = vpop.f32.mrf.mxu1 }
  0x8a   :  { %980 = vmatmul.msk.bf16.gmra.mxu1 %vm340_vm0, %v875_v36 }
  0x8e   :  { %v532_v46 = vpop.f32.mrf.mxu3 }
  0x8f   :  { %v489_v44 = vpop.f32.mrf.mxu1 }
  0x91   :  { %432 = vmatmul.bf16.gmra.mxu0 %v863_v42 }
  0x92   :  { %472 = vmatmul.bf16.gmra.mxu2 %v927_v43 }
  0x96   :  { %v534_v53 = vpop.f32.mrf.mxu3 }
  0x97   :  { %v492_v45 = vpop.f32.mrf.mxu1 }
  0x9e   :  { %v398_v48 = vpop.f32.mrf.mxu0  ;;  %v537_v5 = vpop.f32.mrf.mxu3 }
  0x9f   :  { %v488_v49 = vadd.f32 %v487_v37, %v398_v48  ;;  %v494_v50 = vpop.f32.mrf.mxu1 }
  0xa1   :  { %v567_v51 = vadd.f32 %v488_v49, %v52_v47 }
  0xa3   :  { %600 = vst.msk [vmem:[#allocation2] sm:$0xff] %vm19_vm1, %v567_v51 }
  0xa5   :  { %v1334_v52 = vpop.f32.mrf.mxu2 }
  0xa6   :  { %v400_v55 = vpop.f32.mrf.mxu0  ;;  %v539_v20 = vpop.f32.mrf.mxu3 }
  0xa7   :  { %v490_v57 = vadd.f32 %v489_v44, %v400_v55  ;;  %v497_v58 = vpop.f32.mrf.mxu1 }
  0xa9   :  { %v568_v59 = vadd.f32 %v490_v57, %v53_v54 }
  0xaa   :  { %v635_v60 = vld [vmem:[#allocation2] sm:$0xff] }
  0xab   :  { %v671_v61 = vadd.f32 %v1339_v56, %v635_v60  ;;  %601 = vst.msk [vmem:[#allocation2 + $0x8] sm:$0xff] %vm19_vm1, %v568_v59  ;;  %v73_v60 = vld [vmem:[#allocation2 + $0xa8] sm:$0xff] }
  0xad   :  { %v703_v62 = vmax.f32 %v671_v61, 0.0  ;;  %v1343_v63 = vpop.f32.mrf.mxu2 }
  0xae   :  { %v403_v1 = vpop.f32.mrf.mxu0  ;;  %v542_v38 = vpop.f32.mrf.mxu3 }
  0xaf   :  { %v735_v2 = vpack.c.bf16 %v703_v62, %v703_v62  ;;  %v493_v3 = vadd.f32 %v492_v45, %v403_v1  ;;  %v499_v4 = vpop.f32.mrf.mxu1  ;;  %v57_v45 = vld [vmem:[#allocation2 + $0x28] sm:$0xff] }
  0xb1   :  { %768 = vst.msk [vmem:[%s1566_s3] sm:$0xf] %vm767_vm2, %v735_v2  ;;  %v569_v6 = vadd.f32 %v493_v3, %v54_v0  ;;  %v58_v2 = vld [vmem:[#allocation2 + $0x30] sm:$0xff] }
  0xb2   :  { %v636_v7 = vld [vmem:[#allocation2 + $0x8] sm:$0xff] }
  0xb3   :  { %v672_v8 = vadd.f32 %v1339_v56, %v636_v7  ;;  %602 = vst.msk [vmem:[#allocation2 + $0x10] sm:$0xff] %vm19_vm1, %v569_v6 }
  0xb5   :  { %v704_v9 = vmax.f32 %v672_v8, 0.0  ;;  %v443_v11 = vpop.f32.mrf.mxu2 }
  0xb6   :  { %v533_v12 = vadd.f32 %v532_v46, %v443_v11  ;;  %v405_v14 = vpop.f32.mrf.mxu0  ;;  %v544_v62 = vpop.f32.mrf.mxu3 }
  0xb7   :  { %v736_v15 = vpack.c.bf16 %v704_v9, %v704_v9  ;;  %v495_v16 = vadd.f32 %v494_v50, %v405_v14  ;;  %v502_v17 = vpop.f32.mrf.mxu1 }
  0xb8   :  { %v585_v18 = vadd.f32 %v533_v12, %v70_v10 }
  0xb9   :  { %769 = vst.msk [vmem:[%s1566_s3 + $0x4] sm:$0xf] %vm767_vm2, %v736_v15  ;;  %v570_v19 = vadd.f32 %v495_v16, %v55_v13  ;;  %v74_v15 = vld [vmem:[#allocation2 + $0xb0] sm:$0xff] }
  0xba   :  { %v637_v21 = vld [vmem:[#allocation2 + $0x10] sm:$0xff]  ;;  %618 = vst.msk [vmem:[#allocation2 + $0x90] sm:$0xff] %vm19_vm1, %v585_v18 }
  0xbb   :  { %v673_v22 = vadd.f32 %v1339_v56, %v637_v21  ;;  %603 = vst.msk [vmem:[#allocation2 + $0x18] sm:$0xff] %vm19_vm1, %v570_v19  ;;  %v59_v19 = vld [vmem:[#allocation2 + $0x38] sm:$0xff] }
  0xbd   :  { %v705_v23 = vmax.f32 %v673_v22, 0.0  ;;  %v445_v25 = vpop.f32.mrf.mxu2 }
  0xbe   :  { %v535_v26 = vadd.f32 %v534_v53, %v445_v25  ;;  %v408_v28 = vpop.f32.mrf.mxu0 }
  0xbf   :  { %v737_v29 = vpack.c.bf16 %v705_v23, %v705_v23  ;;  %v498_v30 = vadd.f32 %v497_v58, %v408_v28  ;;  %v1358_v31 = vpop.f32.mrf.mxu1 }
  0xc0   :  { %v586_v32 = vadd.f32 %v535_v26, %v71_v24  ;;  %v547_v24 = vpop.f32.mrf.mxu3 }
  0xc1   :  { %770 = vst.msk [vmem:[%s1566_s3 + $0x8] sm:$0xf] %vm767_vm2, %v737_v29  ;;  %v653_v33 = vld [vmem:[#allocation2 + $0x90] sm:$0xff]  ;;  %v571_v34 = vadd.f32 %v498_v30, %v56_v27 }
  0xc2   :  { %v689_v35 = vadd.f32 %v1339_v56, %v653_v33  ;;  %v638_v36 = vld [vmem:[#allocation2 + $0x18] sm:$0xff]  ;;  %619 = vst.msk [vmem:[#allocation2 + $0x98] sm:$0xff] %vm19_vm1, %v586_v32 }
  0xc3   :  { %v674_v37 = vadd.f32 %v1339_v56, %v638_v36  ;;  %604 = vst.msk [vmem:[#allocation2 + $0x20] sm:$0xff] %vm19_vm1, %v571_v34  ;;  %v75_v33 = vld [vmem:[#allocation2 + $0xb8] sm:$0xff] }
  0xc4   :  { %v721_v39 = vmax.f32 %v689_v35, 0.0 }
  0xc5   :  { %v706_v40 = vmax.f32 %v674_v37, 0.0  ;;  %v448_v42 = vpop.f32.mrf.mxu2  ;;  %v60_v37 = vld [vmem:[#allocation2 + $0x40] sm:$0xff] }
  0xc6   :  { %v753_v43 = vpack.c.bf16 %v721_v39, %v721_v39  ;;  %v538_v44 = vadd.f32 %v537_v5, %v448_v42  ;;  %v410_v46 = vpop.f32.mrf.mxu0 }
  0xc7   :  { %v738_v47 = vpack.c.bf16 %v706_v40, %v706_v40  ;;  %v500_v48 = vadd.f32 %v499_v4, %v410_v46  ;;  %v1368_v49 = vpop.f32.mrf.mxu1 }
  0xc8   :  { %786 = vst.msk [vmem:[%s1566_s3 + $0x48] sm:$0xf] %vm767_vm2, %v753_v43  ;;  %v587_v50 = vadd.f32 %v538_v44, %v72_v41 }
  0xc9   :  { %771 = vst.msk [vmem:[%s1566_s3 + $0xc] sm:$0xf] %vm767_vm2, %v738_v47  ;;  %v654_v51 = vld [vmem:[#allocation2 + $0x98] sm:$0xff]  ;;  %v572_v53 = vadd.f32 %v500_v48, %v57_v45  ;;  %v549_v45 = vpop.f32.mrf.mxu3 }
  0xca   :  { %v690_v54 = vadd.f32 %v1339_v56, %v654_v51  ;;  %v639_v55 = vld [vmem:[#allocation2 + $0x20] sm:$0xff]  ;;  %620 = vst.msk [vmem:[#allocation2 + $0xa0] sm:$0xff] %vm19_vm1, %v587_v50 }
  0xcb   :  { %v675_v57 = vadd.f32 %v1339_v56, %v639_v55  ;;  %605 = vst.msk [vmem:[#allocation2 + $0x28] sm:$0xff] %vm19_vm1, %v572_v53  ;;  %v76_v51 = vld [vmem:[#allocation2 + $0xc0] sm:$0xff] }
  0xcc   :  { %v722_v58 = vmax.f32 %v690_v54, 0.0 }
  0xcd   :  { %v707_v59 = vmax.f32 %v675_v57, 0.0  ;;  %v450_v61 = vpop.f32.mrf.mxu2  ;;  %v61_v57 = vld [vmem:[#allocation2 + $0x48] sm:$0xff] }
  0xce   :  { %v754_v0 = vpack.c.bf16 %v722_v58, %v722_v58  ;;  %v540_v1 = vadd.f32 %v539_v20, %v450_v61  ;;  %v413_v3 = vpop.f32.mrf.mxu0 }
  0xcf   :  { %v739_v4 = vpack.c.bf16 %v707_v59, %v707_v59  ;;  %v503_v5 = vadd.f32 %v502_v17, %v413_v3  ;;  %v1382_v6 = vpop.f32.mrf.mxu1 }
  0xd0   :  { %787 = vst.msk [vmem:[%s1566_s3 + $0x4c] sm:$0xf] %vm767_vm2, %v754_v0  ;;  %v588_v7 = vadd.f32 %v540_v1, %v73_v60 }
  0xd1   :  { %772 = vst.msk [vmem:[%s1566_s3 + $0x10] sm:$0xf] %vm767_vm2, %v739_v4  ;;  %v655_v8 = vld [vmem:[#allocation2 + $0xa0] sm:$0xff]  ;;  %v573_v9 = vadd.f32 %v503_v5, %v58_v2  ;;  %v552_v5 = vpop.f32.mrf.mxu3 }
  0xd2   :  { %v691_v10 = vadd.f32 %v1339_v56, %v655_v8  ;;  %v640_v11 = vld [vmem:[#allocation2 + $0x28] sm:$0xff]  ;;  %621 = vst.msk [vmem:[#allocation2 + $0xa8] sm:$0xff] %vm19_vm1, %v588_v7 }
  0xd3   :  { %v676_v12 = vadd.f32 %v1339_v56, %v640_v11  ;;  %606 = vst.msk [vmem:[#allocation2 + $0x30] sm:$0xff] %vm19_vm1, %v573_v9  ;;  %v77_v8 = vld [vmem:[#allocation2 + $0xc8] sm:$0xff] }
  0xd4   :  { %v723_v13 = vmax.f32 %v691_v10, 0.0 }
  0xd5   :  { %v708_v14 = vmax.f32 %v676_v12, 0.0  ;;  %v453_v16 = vpop.f32.mrf.mxu2  ;;  %v62_v12 = vld [vmem:[#allocation2 + $0x50] sm:$0xff] }
  0xd6   :  { %v755_v17 = vpack.c.bf16 %v723_v13, %v723_v13  ;;  %v543_v18 = vadd.f32 %v542_v38, %v453_v16  ;;  %v415_v20 = vpop.f32.mrf.mxu0 }
  0xd7   :  { %v740_v21 = vpack.c.bf16 %v708_v14, %v708_v14  ;;  %v505_v22 = vadd.f32 %v1358_v31, %v415_v20  ;;  %v1397_v23 = vpop.f32.mrf.mxu1 }
  0xd8   :  { %788 = vst.msk [vmem:[%s1566_s3 + $0x50] sm:$0xf] %vm767_vm2, %v755_v17  ;;  %v589_v25 = vadd.f32 %v543_v18, %v74_v15 }
  0xd9   :  { %773 = vst.msk [vmem:[%s1566_s3 + $0x14] sm:$0xf] %vm767_vm2, %v740_v21  ;;  %v656_v26 = vld [vmem:[#allocation2 + $0xa8] sm:$0xff]  ;;  %v574_v27 = vadd.f32 %v505_v22, %v59_v19 }
  0xda   :  { %v692_v28 = vadd.f32 %v1339_v56, %v656_v26  ;;  %v641_v29 = vld [vmem:[#allocation2 + $0x30] sm:$0xff]  ;;  %622 = vst.msk [vmem:[#allocation2 + $0xb0] sm:$0xff] %vm19_vm1, %v589_v25 }
  0xdb   :  { %v677_v30 = vadd.f32 %v1339_v56, %v641_v29  ;;  %607 = vst.msk [vmem:[#allocation2 + $0x38] sm:$0xff] %vm19_vm1, %v574_v27  ;;  %v78_v25 = vld [vmem:[#allocation2 + $0xd0] sm:$0xff]  ;;  %v554_v27 = vpop.f32.mrf.mxu3 }
  0xdc   :  { %v724_v31 = vmax.f32 %v692_v28, 0.0 }
  0xdd   :  { %v709_v32 = vmax.f32 %v677_v30, 0.0  ;;  %v455_v34 = vpop.f32.mrf.mxu2  ;;  %v63_v30 = vld [vmem:[#allocation2 + $0x58] sm:$0xff] }
  0xde   :  { %v756_v35 = vpack.c.bf16 %v724_v31, %v724_v31  ;;  %v545_v36 = vadd.f32 %v544_v62, %v455_v34  ;;  %v418_v38 = vpop.f32.mrf.mxu0 }
  0xdf   :  { %v741_v39 = vpack.c.bf16 %v709_v32, %v709_v32  ;;  %v508_v40 = vadd.f32 %v1368_v49, %v418_v38  ;;  %v1412_v41 = vpop.f32.mrf.mxu1 }
  0xe0   :  { %789 = vst.msk [vmem:[%s1566_s3 + $0x54] sm:$0xf] %vm767_vm2, %v756_v35  ;;  %v590_v42 = vadd.f32 %v545_v36, %v75_v33 }
  0xe1   :  { %774 = vst.msk [vmem:[%s1566_s3 + $0x18] sm:$0xf] %vm767_vm2, %v741_v39  ;;  %v657_v43 = vld [vmem:[#allocation2 + $0xb0] sm:$0xff]  ;;  %v575_v44 = vadd.f32 %v508_v40, %v60_v37 }
  0xe2   :  { %v693_v46 = vadd.f32 %v1339_v56, %v657_v43  ;;  %v642_v47 = vld [vmem:[#allocation2 + $0x38] sm:$0xff]  ;;  %623 = vst.msk [vmem:[#allocation2 + $0xb8] sm:$0xff] %vm19_vm1, %v590_v42 }
  0xe3   :  { %v678_v48 = vadd.f32 %v1339_v56, %v642_v47  ;;  %608 = vst.msk [vmem:[#allocation2 + $0x40] sm:$0xff] %vm19_vm1, %v575_v44  ;;  %v79_v43 = vld [vmem:[#allocation2 + $0xd8] sm:$0xff]  ;;  %v64_v47 = vld [vmem:[#allocation2 + $0x60] sm:$0xff] }
  0xe4   :  { %v725_v49 = vmax.f32 %v693_v46, 0.0 }
  0xe5   :  { %v710_v50 = vmax.f32 %v678_v48, 0.0  ;;  %v458_v53 = vpop.f32.mrf.mxu2 }
  0xe6   :  { %v757_v54 = vpack.c.bf16 %v725_v49, %v725_v49  ;;  %v548_v55 = vadd.f32 %v547_v24, %v458_v53  ;;  %v420_v58 = vpop.f32.mrf.mxu0 }
  0xe7   :  { %v742_v59 = vpack.c.bf16 %v710_v50, %v710_v50  ;;  %v510_v60 = vadd.f32 %v1382_v6, %v420_v58  ;;  %v1427_v61 = vpop.f32.mrf.mxu1  ;;  %v557_v50 = vpop.f32.mrf.mxu3 }
  0xe8   :  { %790 = vst.msk [vmem:[%s1566_s3 + $0x58] sm:$0xf] %vm767_vm2, %v757_v54  ;;  %v591_v62 = vadd.f32 %v548_v55, %v76_v51 }
  0xe9   :  { %775 = vst.msk [vmem:[%s1566_s3 + $0x1c] sm:$0xf] %vm767_vm2, %v742_v59  ;;  %v658_v0 = vld [vmem:[#allocation2 + $0xb8] sm:$0xff]  ;;  %v576_v1 = vadd.f32 %v510_v60, %v61_v57 }
  0xea   :  { %v694_v2 = vadd.f32 %v1339_v56, %v658_v0  ;;  %v643_v3 = vld [vmem:[#allocation2 + $0x40] sm:$0xff]  ;;  %624 = vst.msk [vmem:[#allocation2 + $0xc0] sm:$0xff] %vm19_vm1, %v591_v62 }
  0xeb   :  { %v679_v4 = vadd.f32 %v1339_v56, %v643_v3  ;;  %609 = vst.msk [vmem:[#allocation2 + $0x48] sm:$0xff] %vm19_vm1, %v576_v1  ;;  %v80_v0 = vld [vmem:[#allocation2 + $0xe0] sm:$0xff] }
  0xec   :  { %v726_v6 = vmax.f32 %v694_v2, 0.0 }
  0xed   :  { %v711_v7 = vmax.f32 %v679_v4, 0.0  ;;  %v460_v9 = vpop.f32.mrf.mxu2  ;;  %v65_v4 = vld [vmem:[#allocation2 + $0x68] sm:$0xff] }
  0xee   :  { %v758_v10 = vpack.c.bf16 %v726_v6, %v726_v6  ;;  %v550_v11 = vadd.f32 %v549_v45, %v460_v9  ;;  %v423_v13 = vpop.f32.mrf.mxu0 }
  0xef   :  { %v743_v14 = vpack.c.bf16 %v711_v7, %v711_v7  ;;  %v513_v15 = vadd.f32 %v1397_v23, %v423_v13  ;;  %v1442_v16 = vpop.f32.mrf.mxu1  ;;  %v559_v13 = vpop.f32.mrf.mxu3 }
  0xf0   :  { %791 = vst.msk [vmem:[%s1566_s3 + $0x5c] sm:$0xf] %vm767_vm2, %v758_v10  ;;  %v592_v17 = vadd.f32 %v550_v11, %v77_v8  ;;  %v68_v8 = vld [vmem:[#allocation2 + $0x80] sm:$0xff] }
  0xf1   :  { %776 = vst.msk [vmem:[%s1566_s3 + $0x20] sm:$0xf] %vm767_vm2, %v743_v14  ;;  %v659_v18 = vld [vmem:[#allocation2 + $0xc0] sm:$0xff]  ;;  %v577_v19 = vadd.f32 %v513_v15, %v62_v12 }
  0xf2   :  { %v695_v20 = vadd.f32 %v1339_v56, %v659_v18  ;;  %v644_v21 = vld [vmem:[#allocation2 + $0x48] sm:$0xff]  ;;  %625 = vst.msk [vmem:[#allocation2 + $0xc8] sm:$0xff] %vm19_vm1, %v592_v17 }
  0xf3   :  { %v680_v22 = vadd.f32 %v1339_v56, %v644_v21  ;;  %610 = vst.msk [vmem:[#allocation2 + $0x50] sm:$0xff] %vm19_vm1, %v577_v19 }
  0xf4   :  { %v727_v23 = vmax.f32 %v695_v20, 0.0  ;;  %v81_v20 = vld [vmem:[#allocation2 + $0xe8] sm:$0xff] }
  0xf5   :  { %v712_v24 = vmax.f32 %v680_v22, 0.0  ;;  %v463_v26 = vpop.f32.mrf.mxu2 }
  0xf6   :  { %v759_v28 = vpack.c.bf16 %v727_v23, %v727_v23  ;;  %v553_v29 = vadd.f32 %v552_v5, %v463_v26  ;;  %v425_v31 = vpop.f32.mrf.mxu0 }
  0xf7   :  { %v744_v32 = vpack.c.bf16 %v712_v24, %v712_v24  ;;  %v515_v33 = vadd.f32 %v1412_v41, %v425_v31  ;;  %v1457_v34 = vpop.f32.mrf.mxu1  ;;  %v66_v24 = vld [vmem:[#allocation2 + $0x70] sm:$0xff] }
  0xf8   :  { %792 = vst.msk [vmem:[%s1566_s3 + $0x60] sm:$0xf] %vm767_vm2, %v759_v28  ;;  %v593_v35 = vadd.f32 %v553_v29, %v78_v25  ;;  %v69_v28 = vld [vmem:[#allocation2 + $0x88] sm:$0xff] }
  0xf9   :  { %777 = vst.msk [vmem:[%s1566_s3 + $0x24] sm:$0xf] %vm767_vm2, %v744_v32  ;;  %v660_v36 = vld [vmem:[#allocation2 + $0xc8] sm:$0xff]  ;;  %v578_v37 = vadd.f32 %v515_v33, %v63_v30 }
  0xfa   :  { %v696_v38 = vadd.f32 %v1339_v56, %v660_v36  ;;  %v645_v39 = vld [vmem:[#allocation2 + $0x50] sm:$0xff]  ;;  %626 = vst.msk [vmem:[#allocation2 + $0xd0] sm:$0xff] %vm19_vm1, %v593_v35 }
  0xfb   :  { %v681_v40 = vadd.f32 %v1339_v56, %v645_v39  ;;  %611 = vst.msk [vmem:[#allocation2 + $0x58] sm:$0xff] %vm19_vm1, %v578_v37  ;;  %v562_v39 = vpop.f32.mrf.mxu3 }
  0xfc   :  { %v728_v41 = vmax.f32 %v696_v38, 0.0 }
  0xfd   :  { %v713_v42 = vmax.f32 %v681_v40, 0.0  ;;  %v465_v44 = vpop.f32.mrf.mxu2 }
  0xfe   :  { %v760_v45 = vpack.c.bf16 %v728_v41, %v728_v41  ;;  %v555_v46 = vadd.f32 %v554_v27, %v465_v44  ;;  %v428_v48 = vpop.f32.mrf.mxu0 }
  0xff   :  { %v745_v49 = vpack.c.bf16 %v713_v42, %v713_v42  ;;  %v518_v51 = vadd.f32 %v1427_v61, %v428_v48  ;;  %v1472_v53 = vpop.f32.mrf.mxu1  ;;  %v82_v42 = vld [vmem:[#allocation2 + $0xf0] sm:$0xff] }
 0x100   :  { %793 = vst.msk [vmem:[%s1566_s3 + $0x64] sm:$0xf] %vm767_vm2, %v760_v45  ;;  %v594_v54 = vadd.f32 %v555_v46, %v79_v43 }
 0x101   :  { %778 = vst.msk [vmem:[%s1566_s3 + $0x28] sm:$0xf] %vm767_vm2, %v745_v49  ;;  %v661_v55 = vld [vmem:[#allocation2 + $0xd0] sm:$0xff]  ;;  %v579_v57 = vadd.f32 %v518_v51, %v64_v47  ;;  %v67_v47 = vld [vmem:[#allocation2 + $0x78] sm:$0xff] }
 0x102   :  { %v697_v58 = vadd.f32 %v1339_v56, %v661_v55  ;;  %v646_v59 = vld [vmem:[#allocation2 + $0x58] sm:$0xff]  ;;  %627 = vst.msk [vmem:[#allocation2 + $0xd8] sm:$0xff] %vm19_vm1, %v594_v54 }
 0x103   :  { %v682_v60 = vadd.f32 %v1339_v56, %v646_v59  ;;  %612 = vst.msk [vmem:[#allocation2 + $0x60] sm:$0xff] %vm19_vm1, %v579_v57 }
 0x104   :  { %v729_v61 = vmax.f32 %v697_v58, 0.0 }
 0x105   :  { %v714_v62 = vmax.f32 %v682_v60, 0.0  ;;  %v468_v1 = vpop.f32.mrf.mxu2 }
 0x106   :  { %v761_v2 = vpack.c.bf16 %v729_v61, %v729_v61  ;;  %v558_v3 = vadd.f32 %v557_v50, %v468_v1  ;;  %v430_v5 = vpop.f32.mrf.mxu0  ;;  %v564_v1 = vpop.f32.mrf.mxu3 }
 0x107   :  { %v746_v6 = vpack.c.bf16 %v714_v62, %v714_v62  ;;  %v520_v7 = vadd.f32 %v1442_v16, %v430_v5  ;;  %v527_v9 = vpop.f32.mrf.mxu1 }
 0x108   :  { %794 = vst.msk [vmem:[%s1566_s3 + $0x68] sm:$0xf] %vm767_vm2, %v761_v2  ;;  %v595_v10 = vadd.f32 %v558_v3, %v80_v0  ;;  %v528_v11 = vadd.f32 %v527_v9, %v1334_v52  ;;  %v83_v2 = vld [vmem:[#allocation2 + $0xf8] sm:$0xff] }
 0x109   :  { %779 = vst.msk [vmem:[%s1566_s3 + $0x2c] sm:$0xf] %vm767_vm2, %v746_v6  ;;  %v662_v12 = vld [vmem:[#allocation2 + $0xd8] sm:$0xff]  ;;  %v580_v14 = vadd.f32 %v520_v7, %v65_v4 }
 0x10a   :  { %v698_v15 = vadd.f32 %v1339_v56, %v662_v12  ;;  %v647_v16 = vld [vmem:[#allocation2 + $0x60] sm:$0xff]  ;;  %628 = vst.msk [vmem:[#allocation2 + $0xe0] sm:$0xff] %vm19_vm1, %v595_v10  ;;  %v583_v17 = vadd.f32 %v528_v11, %v68_v8 }
 0x10b   :  { %v683_v18 = vadd.f32 %v1339_v56, %v647_v16  ;;  %613 = vst.msk [vmem:[#allocation2 + $0x68] sm:$0xff] %vm19_vm1, %v580_v14 }
 0x10c   :  { %v730_v19 = vmax.f32 %v698_v15, 0.0  ;;  %616 = vst.msk [vmem:[#allocation2 + $0x80] sm:$0xff] %vm19_vm1, %v583_v17 }
 0x10d   :  { %v715_v52 = vmax.f32 %v683_v18, 0.0  ;;  %v470_v21 = vpop.f32.mrf.mxu2 }
 0x10e   :  { %v762_v22 = vpack.c.bf16 %v730_v19, %v730_v19  ;;  %v560_v23 = vadd.f32 %v559_v13, %v470_v21  ;;  %v433_v25 = vpop.f32.mrf.mxu0 }
 0x10f   :  { %v747_v26 = vpack.c.bf16 %v715_v52, %v715_v52  ;;  %v523_v27 = vadd.f32 %v1457_v34, %v433_v25  ;;  %v529_v29 = vpop.f32.mrf.mxu1 }
 0x110   :  { %795 = vst.msk [vmem:[%s1566_s3 + $0x6c] sm:$0xf] %vm767_vm2, %v762_v22  ;;  %v596_v30 = vadd.f32 %v560_v23, %v81_v20  ;;  %v530_v31 = vadd.f32 %v529_v29, %v1343_v63 }
 0x111   :  { %780 = vst.msk [vmem:[%s1566_s3 + $0x30] sm:$0xf] %vm767_vm2, %v747_v26  ;;  %v663_v32 = vld [vmem:[#allocation2 + $0xe0] sm:$0xff]  ;;  %v581_v33 = vadd.f32 %v523_v27, %v66_v24 }
 0x112   :  { %v699_v35 = vadd.f32 %v1339_v56, %v663_v32  ;;  %v648_v34 = vld [vmem:[#allocation2 + $0x68] sm:$0xff]  ;;  %629 = vst.msk [vmem:[#allocation2 + $0xe8] sm:$0xff] %vm19_vm1, %v596_v30  ;;  %v584_v36 = vadd.f32 %v530_v31, %v69_v28 }
 0x113   :  { %v684_v37 = vadd.f32 %v1339_v56, %v648_v34  ;;  %v651_v38 = vld [vmem:[#allocation2 + $0x80] sm:$0xff]  ;;  %614 = vst.msk [vmem:[#allocation2 + $0x70] sm:$0xff] %vm19_vm1, %v581_v33 }
 0x114   :  { %v731_v63 = vmax.f32 %v699_v35, 0.0  ;;  %v687_v40 = vadd.f32 %v1339_v56, %v651_v38  ;;  %617 = vst.msk [vmem:[#allocation2 + $0x88] sm:$0xff] %vm19_vm1, %v584_v36 }
 0x115   :  { %v716_v41 = vmax.f32 %v684_v37, 0.0  ;;  %v473_v43 = vpop.f32.mrf.mxu2 }
 0x116   :  { %v763_v44 = vpack.c.bf16 %v731_v63, %v731_v63  ;;  %v719_v45 = vmax.f32 %v687_v40, 0.0  ;;  %v563_v46 = vadd.f32 %v562_v39, %v473_v43  ;;  %v435_v48 = vpop.f32.mrf.mxu0 }
 0x117   :  { %v748_v49 = vpack.c.bf16 %v716_v41, %v716_v41  ;;  %v525_v50 = vadd.f32 %v1472_v53, %v435_v48 }
 0x118   :  { %796 = vst.msk [vmem:[%s1566_s3 + $0x70] sm:$0xf] %vm767_vm2, %v763_v44  ;;  %v751_v51 = vpack.c.bf16 %v719_v45, %v719_v45  ;;  %v597_v54 = vadd.f32 %v563_v46, %v82_v42 }
 0x119   :  { %781 = vst.msk [vmem:[%s1566_s3 + $0x34] sm:$0xf] %vm767_vm2, %v748_v49  ;;  %v664_v55 = vld [vmem:[#allocation2 + $0xe8] sm:$0xff]  ;;  %v582_v57 = vadd.f32 %v525_v50, %v67_v47 }
 0x11a   :  { %784 = vst.msk [vmem:[%s1566_s3 + $0x40] sm:$0xf] %vm767_vm2, %v751_v51  ;;  %v700_v53 = vadd.f32 %v1339_v56, %v664_v55  ;;  %v649_v58 = vld [vmem:[#allocation2 + $0x70] sm:$0xff] }
 0x11b   :  { %v685_v59 = vadd.f32 %v1339_v56, %v649_v58  ;;  %v652_v60 = vld [vmem:[#allocation2 + $0x88] sm:$0xff]  ;;  %630 = vst.msk [vmem:[#allocation2 + $0xf0] sm:$0xff] %vm19_vm1, %v597_v54 }
 0x11c   :  { %v732_v61 = vmax.f32 %v700_v53, 0.0  ;;  %v688_v62 = vadd.f32 %v1339_v56, %v652_v60  ;;  %615 = vst.msk [vmem:[#allocation2 + $0x78] sm:$0xff] %vm19_vm1, %v582_v57 }
 0x11d   :  { %v717_v0 = vmax.f32 %v685_v59, 0.0  ;;  %v475_v3 = vpop.f32.mrf.mxu2 }
 0x11e   :  { %v764_v4 = vpack.c.bf16 %v732_v61, %v732_v61  ;;  %v720_v5 = vmax.f32 %v688_v62, 0.0  ;;  %v565_v6 = vadd.f32 %v564_v1, %v475_v3 }
 0x11f   :  { %v749_v7 = vpack.c.bf16 %v717_v0, %v717_v0 }
 0x120   :  { %797 = vst.msk [vmem:[%s1566_s3 + $0x74] sm:$0xf] %vm767_vm2, %v764_v4  ;;  %v752_v8 = vpack.c.bf16 %v720_v5, %v720_v5  ;;  %v598_v9 = vadd.f32 %v565_v6, %v83_v2 }
 0x121   :  { %782 = vst.msk [vmem:[%s1566_s3 + $0x38] sm:$0xf] %vm767_vm2, %v749_v7 }
 0x122   :  { %785 = vst.msk [vmem:[%s1566_s3 + $0x44] sm:$0xf] %vm767_vm2, %v752_v8  ;;  %v665_v10 = vld [vmem:[#allocation2 + $0xf0] sm:$0xff] }
 0x123   :  { %v701_v11 = vadd.f32 %v1339_v56, %v665_v10  ;;  %v650_v12 = vld [vmem:[#allocation2 + $0x78] sm:$0xff]  ;;  %631 = vst.msk [vmem:[#allocation2 + $0xf8] sm:$0xff] %vm19_vm1, %v598_v9 }
 0x124   :  { %v686_v13 = vadd.f32 %v1339_v56, %v650_v12 }
 0x125   :  { %v733_v14 = vmax.f32 %v701_v11, 0.0 }
 0x126   :  { %v718_v15 = vmax.f32 %v686_v13, 0.0 }
 0x127   :  { %v765_v16 = vpack.c.bf16 %v733_v14, %v733_v14 }
 0x128   :  { %v750_v17 = vpack.c.bf16 %v718_v15, %v718_v15 }
 0x129   :  { %798 = vst.msk [vmem:[%s1566_s3 + $0x78] sm:$0xf] %vm767_vm2, %v765_v16 }
 0x12a   :  { %783 = vst.msk [vmem:[%s1566_s3 + $0x3c] sm:$0xf] %vm767_vm2, %v750_v17  ;;  %v666_v18 = vld [vmem:[#allocation2 + $0xf8] sm:$0xff] }
 0x12b   :  { %v702_v19 = vadd.f32 %v1339_v56, %v666_v18 }
 0x12d   :  { %v734_v52 = vmax.f32 %v702_v19, 0.0 }
 0x12f   :  { %v766_v20 = vpack.c.bf16 %v734_v52, %v734_v52 }
 0x131   :  { %799 = vst.msk [vmem:[%s1566_s3 + $0x7c] sm:$0xf] %vm767_vm2, %v766_v20 }

</bundles_post_ra>
